<compile_context>
chip_gen: v7x
topology: tpu7x:2x2x1
jax: 0.10.0
libtpu: 0.0.40
codegen_flags: <defaults>
</compile_context>

<pallas_src>
import functools
import math

import jax
import jax.numpy as jnp
import numpy as np
from jax.experimental import pallas as pl
from jax.experimental.pallas import tpu as pltpu


def _ceil_to(n, m):
    return ((n + m - 1) // m) * m


def _rnn_kernel(x_ref, w_in_ref, w_hh_ref, misc_ref, out_ref, *,
                activation, layer_num, hidden_size, row_bx, row_bo):
    """Whole recurrence in a single invocation (everything resident in VMEM).

    x_ref    : (B, L*I)        bf16   inputs, step-major along lanes
    w_in_ref : (L*I, L*H)      bf16   block-diagonal W_hx packing
    w_hh_ref : (L, H, H)       bf16   hidden->hidden weights
    misc_ref : (rows, L*H)     f32    [0:H]=lane-padded W_o, [row_bx]=b_hx+b_hh,
                                      [row_bo]=lane-padded b_o
    out_ref  : (B, L*H)        f32    lane-dense output; real result is [:, :O]
    """
    H = hidden_size
    if activation == 'R':
        act = lambda v: jnp.maximum(v, 0.0)
    elif activation == 'T':
        act = jnp.tanh
    elif activation == 'S':
        act = jax.nn.sigmoid
    else:
        raise ValueError(f"unknown activation {activation}")

    w_o = misc_ref[0:H, :]                      # (H, L*H) f32, lanes >= O are zero
    b_in = misc_ref[row_bx:row_bx + 1, :]       # (1, L*H) f32, pre-summed b_hx + b_hh
    b_out = misc_ref[row_bo:row_bo + 1, :]      # (1, L*H) f32, b_o zero-padded

    # All L input projections in ONE lane-dense bf16 MXU pass (off the serial chain),
    # accumulated in f32; bias added once for all steps.
    xp = jnp.dot(x_ref[...], w_in_ref[...],
                 preferred_element_type=jnp.float32) + b_in        # (B, L*H) f32

    # Serial recurrence, fully unrolled at trace time.
    # h0 == 0  =>  step 0 is just act(xp[:, :H]) (drops one matmul from the chain).
    # Dot operands cast to bf16 -> single MXU pass per dependent step.
    h = act(xp[:, 0:H])
    for i in range(1, layer_num):
        hw = jnp.dot(h.astype(jnp.bfloat16), w_hh_ref[i],
                     preferred_element_type=jnp.float32)
        h = act(hw + xp[:, i * H:(i + 1) * H])

    # Fused output projection against the lane-padded W_o; lane-dense store.
    out_ref[...] = (jnp.dot(h, w_o, preferred_element_type=jnp.float32) + b_out
                    ).astype(out_ref.dtype)


def rnn_forward(X, W_hx, b_hx, W_hh, b_hh, W_o, b_o, *, activation='T'):
    """X: (batch, input_size, layer_num) float32.  Returns squeeze((batch, output_size))."""
    B, I, L = X.shape
    H = W_hh.shape[-1]
    O = W_o.shape[-1]
    LH = L * H

    # ---- call-invariant packing (wrapper / XLA side) ---------------------------------
    # Step-major flattened input: x_flat[:, l*I:(l+1)*I] == X[:, :, l]
    x_flat = jnp.transpose(X, (0, 2, 1)).reshape(B, L * I).astype(jnp.bfloat16)

    # Block-diagonal W_hx: w_in[l*I+i, l*H+h] = W_hx[l, i, h]
    eye = jnp.eye(L, dtype=W_hx.dtype)
    w_in = (W_hx[:, :, None, :] * eye[:, None, :, None]).reshape(L * I, LH)
    w_in = w_in.astype(jnp.bfloat16)

    w_hh_bf16 = W_hh.astype(jnp.bfloat16)

    # One f32 misc buffer: lane-padded W_o, pre-summed input bias, lane-padded b_o.
    row_bx = _ceil_to(H, 8)          # 8-aligned sublane offsets for cheap row reads
    row_bo = row_bx + 8
    rows = row_bo + 8
    misc = jnp.zeros((rows, LH), jnp.float32)
    misc = misc.at[0:H, 0:O].set(W_o.astype(jnp.float32))
    misc = misc.at[row_bx, :].set((b_hx + b_hh).reshape(LH).astype(jnp.float32))
    misc = misc.at[row_bo, 0:O].set(b_o.astype(jnp.float32))

    kernel = functools.partial(_rnn_kernel, activation=activation, layer_num=L,
                               hidden_size=H, row_bx=row_bx, row_bo=row_bo)

    vmem = pl.BlockSpec(memory_space=pltpu.MemorySpace.VMEM)
    out_full = pl.pallas_call(
        kernel,
        out_shape=jax.ShapeDtypeStruct((B, LH), jnp.float32),
        in_specs=[vmem, vmem, vmem, vmem],
        out_specs=vmem,
    )(x_flat, w_in, w_hh_bf16, misc)

    return jnp.squeeze(out_full[:, :O])


def _reference(X, W_hx, b_hx, W_hh, b_hh, W_o, b_o, activation='T'):
    """Pure-JAX f32 replica of the PyTorch forward for correctness checking."""
    act = {'R': lambda v: jnp.maximum(v, 0.0),
           'T': jnp.tanh,
           'S': jax.nn.sigmoid}[activation]
    B, I, L = X.shape
    H = W_hh.shape[-1]
    h = jnp.zeros((H,), jnp.float32)               # H[0] = zeros(hidden), broadcasts
    for i in range(L):
        xi = X[:, :, i]                            # (B, I)
        h = act(h @ W_hh[i] + b_hh[i] + xi @ W_hx[i] + b_hx[i])
    return jnp.squeeze(h @ W_o + b_o)


if __name__ == "__main__":
    # small shapes implied by the module: X is (batch, input_size, layer_num)
    batch, input_size, layer_num = 8, 16, 8
    hidden_size, output_size = 32, 4
    activation = 'T'

    key = jax.random.PRNGKey(0)
    ks = jax.random.split(key, 7)

    def normal(k, shape):
        # mirrors torch: (rand(shape) - 0.5) / sqrt(150)
        return (jax.random.uniform(k, shape, jnp.float32) - 0.5) / math.sqrt(150.0)

    W_hx = normal(ks[0], (layer_num, input_size, hidden_size))
    b_hx = normal(ks[1], (layer_num, hidden_size))
    W_hh = normal(ks[2], (layer_num, hidden_size, hidden_size))
    b_hh = normal(ks[3], (layer_num, hidden_size))
    # nn.Linear(hidden, output): uniform(-1/sqrt(hidden), 1/sqrt(hidden))
    stdv = 1.0 / math.sqrt(hidden_size)
    W_o = jax.random.uniform(ks[4], (hidden_size, output_size), jnp.float32, -stdv, stdv)
    b_o = jax.random.uniform(ks[5], (output_size,), jnp.float32, -stdv, stdv)

    X = jax.random.uniform(ks[6], (batch, input_size, layer_num), jnp.float32)

    out = rnn_forward(X, W_hx, b_hx, W_hh, b_hh, W_o, b_o, activation=activation)
    out = jax.block_until_ready(out)

    ref = _reference(X, W_hx, b_hx, W_hh, b_hh, W_o, b_o, activation=activation)
    # Tolerance relaxed (per review) because MXU operands are bf16 (f32 accumulate).
    np.testing.assert_allclose(np.asarray(out), np.asarray(ref), rtol=2e-2, atol=2e-2)

    print("KERNEL_OK")
</pallas_src>

<mosaic_0001>
module attributes {stable_mosaic.version = 11 : i64} {
  func.func @_rnn_kernel(%arg0: memref<8x128xbf16, #tpu.memory_space<vmem>>, %arg1: memref<128x256xbf16, #tpu.memory_space<vmem>>, %arg2: memref<8x32x32xbf16, #tpu.memory_space<vmem>>, %arg3: memref<48x256xf32, #tpu.memory_space<vmem>>, %arg4: memref<8x256xf32, #tpu.memory_space<vmem>>) attributes {dimension_semantics = [], scalar_prefetch = 0 : i64, scratch_operands = 0 : i64, tpu.core_type = #tpu.core_type<tc>} {
    %c0 = arith.constant 0 : index
    %c0_0 = arith.constant 0 : index
    %0 = vector.load %arg3[%c0, %c0_0] : memref<48x256xf32, #tpu.memory_space<vmem>>, vector<32x256xf32>
    %c32 = arith.constant 32 : index
    %c0_1 = arith.constant 0 : index
    %1 = vector.load %arg3[%c32, %c0_1] : memref<48x256xf32, #tpu.memory_space<vmem>>, vector<1x256xf32>
    %c40 = arith.constant 40 : index
    %c0_2 = arith.constant 0 : index
    %2 = vector.load %arg3[%c40, %c0_2] : memref<48x256xf32, #tpu.memory_space<vmem>>, vector<1x256xf32>
    %c0_3 = arith.constant 0 : index
    %c0_4 = arith.constant 0 : index
    %3 = vector.load %arg0[%c0_3, %c0_4] : memref<8x128xbf16, #tpu.memory_space<vmem>>, vector<8x128xbf16>
    %c0_5 = arith.constant 0 : index
    %c0_6 = arith.constant 0 : index
    %4 = vector.load %arg1[%c0_5, %c0_6] : memref<128x256xbf16, #tpu.memory_space<vmem>>, vector<128x256xbf16>
    %cst = arith.constant dense<0.000000e+00> : vector<8x256xf32>
    %5 = tpu.matmul %3, %4, %cst {dimension_numbers = #tpu.dot_dimension_numbers<[1], [0], [0], [1], [0, 0, 1, 1], [], []>} : vector<8x128xbf16>, vector<128x256xbf16>, vector<8x256xf32> -> vector<8x256xf32>
    %6 = vector.broadcast %1 : vector<1x256xf32> to vector<8x256xf32>
    %7 = arith.addf %5, %6 : vector<8x256xf32>
    %8 = vector.extract_strided_slice %7 {offsets = [0, 0], sizes = [8, 32], strides = [1, 1]} : vector<8x256xf32> to vector<8x32xf32>
    %9 = math.tanh %8 : vector<8x32xf32>
    %10 = arith.truncf %9 : vector<8x32xf32> to vector<8x32xbf16>
    %c1 = arith.constant 1 : index
    %c0_7 = arith.constant 0 : index
    %c0_8 = arith.constant 0 : index
    %11 = vector.load %arg2[%c1, %c0_7, %c0_8] : memref<8x32x32xbf16, #tpu.memory_space<vmem>>, vector<1x32x32xbf16>
    %12 = vector.shape_cast %11 : vector<1x32x32xbf16> to vector<32x32xbf16>
    %cst_9 = arith.constant dense<0.000000e+00> : vector<8x32xf32>
    %13 = tpu.matmul %10, %12, %cst_9 {dimension_numbers = #tpu.dot_dimension_numbers<[1], [0], [0], [1], [0, 0, 1, 1], [], []>} : vector<8x32xbf16>, vector<32x32xbf16>, vector<8x32xf32> -> vector<8x32xf32>
    %14 = vector.extract_strided_slice %7 {offsets = [0, 32], sizes = [8, 32], strides = [1, 1]} : vector<8x256xf32> to vector<8x32xf32>
    %15 = arith.addf %13, %14 : vector<8x32xf32>
    %16 = math.tanh %15 : vector<8x32xf32>
    %17 = arith.truncf %16 : vector<8x32xf32> to vector<8x32xbf16>
    %c2 = arith.constant 2 : index
    %c0_10 = arith.constant 0 : index
    %c0_11 = arith.constant 0 : index
    %18 = vector.load %arg2[%c2, %c0_10, %c0_11] : memref<8x32x32xbf16, #tpu.memory_space<vmem>>, vector<1x32x32xbf16>
    %19 = vector.shape_cast %18 : vector<1x32x32xbf16> to vector<32x32xbf16>
    %cst_12 = arith.constant dense<0.000000e+00> : vector<8x32xf32>
    %20 = tpu.matmul %17, %19, %cst_12 {dimension_numbers = #tpu.dot_dimension_numbers<[1], [0], [0], [1], [0, 0, 1, 1], [], []>} : vector<8x32xbf16>, vector<32x32xbf16>, vector<8x32xf32> -> vector<8x32xf32>
    %21 = vector.extract_strided_slice %7 {offsets = [0, 64], sizes = [8, 32], strides = [1, 1]} : vector<8x256xf32> to vector<8x32xf32>
    %22 = arith.addf %20, %21 : vector<8x32xf32>
    %23 = math.tanh %22 : vector<8x32xf32>
    %24 = arith.truncf %23 : vector<8x32xf32> to vector<8x32xbf16>
    %c3 = arith.constant 3 : index
    %c0_13 = arith.constant 0 : index
    %c0_14 = arith.constant 0 : index
    %25 = vector.load %arg2[%c3, %c0_13, %c0_14] : memref<8x32x32xbf16, #tpu.memory_space<vmem>>, vector<1x32x32xbf16>
    %26 = vector.shape_cast %25 : vector<1x32x32xbf16> to vector<32x32xbf16>
    %cst_15 = arith.constant dense<0.000000e+00> : vector<8x32xf32>
    %27 = tpu.matmul %24, %26, %cst_15 {dimension_numbers = #tpu.dot_dimension_numbers<[1], [0], [0], [1], [0, 0, 1, 1], [], []>} : vector<8x32xbf16>, vector<32x32xbf16>, vector<8x32xf32> -> vector<8x32xf32>
    %28 = vector.extract_strided_slice %7 {offsets = [0, 96], sizes = [8, 32], strides = [1, 1]} : vector<8x256xf32> to vector<8x32xf32>
    %29 = arith.addf %27, %28 : vector<8x32xf32>
    %30 = math.tanh %29 : vector<8x32xf32>
    %31 = arith.truncf %30 : vector<8x32xf32> to vector<8x32xbf16>
    %c4 = arith.constant 4 : index
    %c0_16 = arith.constant 0 : index
    %c0_17 = arith.constant 0 : index
    %32 = vector.load %arg2[%c4, %c0_16, %c0_17] : memref<8x32x32xbf16, #tpu.memory_space<vmem>>, vector<1x32x32xbf16>
    %33 = vector.shape_cast %32 : vector<1x32x32xbf16> to vector<32x32xbf16>
    %cst_18 = arith.constant dense<0.000000e+00> : vector<8x32xf32>
    %34 = tpu.matmul %31, %33, %cst_18 {dimension_numbers = #tpu.dot_dimension_numbers<[1], [0], [0], [1], [0, 0, 1, 1], [], []>} : vector<8x32xbf16>, vector<32x32xbf16>, vector<8x32xf32> -> vector<8x32xf32>
    %35 = vector.extract_strided_slice %7 {offsets = [0, 128], sizes = [8, 32], strides = [1, 1]} : vector<8x256xf32> to vector<8x32xf32>
    %36 = arith.addf %34, %35 : vector<8x32xf32>
    %37 = math.tanh %36 : vector<8x32xf32>
    %38 = arith.truncf %37 : vector<8x32xf32> to vector<8x32xbf16>
    %c5 = arith.constant 5 : index
    %c0_19 = arith.constant 0 : index
    %c0_20 = arith.constant 0 : index
    %39 = vector.load %arg2[%c5, %c0_19, %c0_20] : memref<8x32x32xbf16, #tpu.memory_space<vmem>>, vector<1x32x32xbf16>
    %40 = vector.shape_cast %39 : vector<1x32x32xbf16> to vector<32x32xbf16>
    %cst_21 = arith.constant dense<0.000000e+00> : vector<8x32xf32>
    %41 = tpu.matmul %38, %40, %cst_21 {dimension_numbers = #tpu.dot_dimension_numbers<[1], [0], [0], [1], [0, 0, 1, 1], [], []>} : vector<8x32xbf16>, vector<32x32xbf16>, vector<8x32xf32> -> vector<8x32xf32>
    %42 = vector.extract_strided_slice %7 {offsets = [0, 160], sizes = [8, 32], strides = [1, 1]} : vector<8x256xf32> to vector<8x32xf32>
    %43 = arith.addf %41, %42 : vector<8x32xf32>
    %44 = math.tanh %43 : vector<8x32xf32>
    %45 = arith.truncf %44 : vector<8x32xf32> to vector<8x32xbf16>
    %c6 = arith.constant 6 : index
    %c0_22 = arith.constant 0 : index
    %c0_23 = arith.constant 0 : index
    %46 = vector.load %arg2[%c6, %c0_22, %c0_23] : memref<8x32x32xbf16, #tpu.memory_space<vmem>>, vector<1x32x32xbf16>
    %47 = vector.shape_cast %46 : vector<1x32x32xbf16> to vector<32x32xbf16>
    %cst_24 = arith.constant dense<0.000000e+00> : vector<8x32xf32>
    %48 = tpu.matmul %45, %47, %cst_24 {dimension_numbers = #tpu.dot_dimension_numbers<[1], [0], [0], [1], [0, 0, 1, 1], [], []>} : vector<8x32xbf16>, vector<32x32xbf16>, vector<8x32xf32> -> vector<8x32xf32>
    %49 = vector.extract_strided_slice %7 {offsets = [0, 192], sizes = [8, 32], strides = [1, 1]} : vector<8x256xf32> to vector<8x32xf32>
    %50 = arith.addf %48, %49 : vector<8x32xf32>
    %51 = math.tanh %50 : vector<8x32xf32>
    %52 = arith.truncf %51 : vector<8x32xf32> to vector<8x32xbf16>
    %c7 = arith.constant 7 : index
    %c0_25 = arith.constant 0 : index
    %c0_26 = arith.constant 0 : index
    %53 = vector.load %arg2[%c7, %c0_25, %c0_26] : memref<8x32x32xbf16, #tpu.memory_space<vmem>>, vector<1x32x32xbf16>
    %54 = vector.shape_cast %53 : vector<1x32x32xbf16> to vector<32x32xbf16>
    %cst_27 = arith.constant dense<0.000000e+00> : vector<8x32xf32>
    %55 = tpu.matmul %52, %54, %cst_27 {dimension_numbers = #tpu.dot_dimension_numbers<[1], [0], [0], [1], [0, 0, 1, 1], [], []>} : vector<8x32xbf16>, vector<32x32xbf16>, vector<8x32xf32> -> vector<8x32xf32>
    %56 = vector.extract_strided_slice %7 {offsets = [0, 224], sizes = [8, 32], strides = [1, 1]} : vector<8x256xf32> to vector<8x32xf32>
    %57 = arith.addf %55, %56 : vector<8x32xf32>
    %58 = math.tanh %57 : vector<8x32xf32>
    %cst_28 = arith.constant dense<0.000000e+00> : vector<8x256xf32>
    %59 = tpu.matmul %58, %0, %cst_28 {dimension_numbers = #tpu.dot_dimension_numbers<[1], [0], [0], [1], [0, 0, 1, 1], [], []>} : vector<8x32xf32>, vector<32x256xf32>, vector<8x256xf32> -> vector<8x256xf32>
    %60 = vector.broadcast %2 : vector<1x256xf32> to vector<8x256xf32>
    %61 = arith.addf %59, %60 : vector<8x256xf32>
    %c0_29 = arith.constant 0 : index
    %c0_30 = arith.constant 0 : index
    %62 = vector.load %arg4[%c0_29, %c0_30] : memref<8x256xf32, #tpu.memory_space<vmem>>, vector<8x256xf32>
    tpu.vector_store %arg4[%c0_29, %c0_30], %61 {strides = array<i32>} : memref<8x256xf32, #tpu.memory_space<vmem>>, vector<8x256xf32>,
    return
  }
}

</mosaic_0001>

<bundles_post_ra>
// kernel: tpu_custom_call.1
= control target key start
LH: loop header
LB: loop body
LE: loop exit
PB: predicated region body
PF: predicated region fallthrough
CT: control target
= control target key end

     0   :  { %9 = vsyncpa [#allocation3], 0  ;;  %s1264_s0 = inlined_call_operand.hbm [shape: bf16[8,128], index: 0, kind: input, shape index: {}]   ;;  %s1265_s1 = inlined_call_operand.hbm [shape: bf16[128,256], index: 1, kind: input, shape index: {}]   ;;  %s1266_s2 = inlined_call_operand.hbm [shape: bf16[8,32,32], index: 2, kind: input, shape index: {}]   ;;  %s1267_s3 = inlined_call_operand.hbm [shape: f32[48,256], index: 3, kind: input, shape index: {}]   ;;  %s1268_s4 = inlined_call_operand.hbm [shape: f32[8,256], index: 4, kind: output, shape index: {}]  }
   0x1   :  { %10 = vsyncpa [#allocation6], 0 }
   0x2   :  { %11 = vsyncpa [#allocation9], 0 }
   0x3   :  { %12 = vsyncpa [#allocation4], 0  ;;  %s1104_s15 = smov [#allocation5]   ;;  %s986_s19 = scalar_lea.hbm %s1265_s1, 2048 }
   0x4   :  { %s28_s16 = sshll.u32 %s1104_s15, 4  ;;  %p987_p0 = scmp.ne.s32.totalorder %s1265_s1, %s986_s19  ;;  %s29_s16 = int_to_ptr.vmem [resolvable:$true] %s28_s16 }
   0x5   :  { %p990_p1 = scmp.lt.u32.totalorder %s986_s19, %s1265_s1 }
   0x7   :  { %p992_p2 = pnand %p990_p1, %p987_p0 }
   0x9   :  { %995 = shalt.err (!%p992_p2)
}
   0xa   :  { %s996_s24 = scalar_lea.vmem %s29_s16, 2048  ;;  %p1001_p4 = scmp.lt.s32.totalorder %s29_s16, %s29_s16 }
   0xb   :  { %p997_p3 = scmp.ne.s32.totalorder %s29_s16, %s996_s24  ;;  %p1002_p5 = scmp.lt.s32.totalorder %s996_s24, %s996_s24 }
   0xd   :  { %p1003_p6 = por %p1002_p5, %p1001_p4 }
   0xf   :  { %p1004_p7 = pnand %p1003_p6, %p997_p3 }
  0x11   :  { %1007 = shalt.err (!%p1004_p7)
}
  0x12   :  { %s1105_s25 = smov 128   ;;  %s1106_s26 = smov 8  }
  0x13   :  { %34 = dma.hbm_to_vmem [thread:$0]  %s1265_s1, 2048, %s29_s16, [#allocation6], %s1105_s25, %s1105_s25, %s1106_s26  }
  0x14   :  { %s1107_s29 = smov [#allocation2]   ;;  %s1108_s5 = smov [#allocation7]  }
  0x15   :  { %s19_s30 = sshll.u32 %s1107_s29, 4  ;;  %s40_s6 = sshll.u32 %s1108_s5, 4  ;;  %s20_s30 = int_to_ptr.vmem [resolvable:$true] %s19_s30  ;;  %s41_s6 = int_to_ptr.vmem [resolvable:$true] %s40_s6 }
  0x16   :  { %s1008_s9 = scalar_lea.hbm %s1264_s0, 64 }
  0x17   :  { %p1009_p8 = scmp.ne.s32.totalorder %s1264_s0, %s1008_s9  ;;  %p1012_p9 = scmp.lt.u32.totalorder %s1008_s9, %s1264_s0 }
  0x19   :  { %p1014_p10 = pnand %p1012_p9, %p1009_p8 }
  0x1b   :  { %1017 = shalt.err (!%p1014_p10)
}
  0x1c   :  { %s1018_s1 = scalar_lea.vmem %s20_s30, 64  ;;  %p1023_p12 = scmp.lt.s32.totalorder %s20_s30, %s20_s30 }
  0x1d   :  { %p1019_p11 = scmp.ne.s32.totalorder %s20_s30, %s1018_s1  ;;  %p1024_p13 = scmp.lt.s32.totalorder %s1018_s1, %s1018_s1 }
  0x1f   :  { %p1025_p0 = por %p1024_p13, %p1023_p12 }
  0x21   :  { %p1026_p1 = pnand %p1025_p0, %p1019_p11 }
  0x23   :  { %1029 = shalt.err (!%p1026_p1)
}
  0x24   :  { %22 = dma.hbm_to_vmem [thread:$0]  %s1264_s0, 64, %s20_s30, [#allocation3]  }
  0x25   :  { %s1030_s18 = scalar_lea.hbm %s1266_s2, 2048 }
  0x26   :  { %p1031_p2 = scmp.ne.s32.totalorder %s1266_s2, %s1030_s18  ;;  %p1034_p3 = scmp.lt.u32.totalorder %s1030_s18, %s1266_s2 }
  0x28   :  { %p1036_p4 = pnand %p1034_p3, %p1031_p2 }
  0x2a   :  { %1039 = shalt.err (!%p1036_p4)
}
  0x2b   :  { %s1040_s23 = scalar_lea.vmem %s41_s6, 2048  ;;  %p1045_p6 = scmp.lt.s32.totalorder %s41_s6, %s41_s6 }
  0x2c   :  { %p1041_p5 = scmp.ne.s32.totalorder %s41_s6, %s1040_s23  ;;  %p1046_p7 = scmp.lt.s32.totalorder %s1040_s23, %s1040_s23 }
  0x2e   :  { %p1047_p8 = por %p1046_p7, %p1045_p6 }
  0x30   :  { %p1048_p9 = pnand %p1047_p8, %p1041_p5 }
  0x32   :  { %1051 = shalt.err (!%p1048_p9)
}
  0x33   :  { %s1109_s0 = smov 64   ;;  %s1110_s24 = smov 4  }
  0x34   :  { %46 = dma.hbm_to_vmem [thread:$0]  %s1266_s2, 2048, %s41_s6, [#allocation6], %s1109_s0, %s1109_s0, %s1110_s24  }
  0x35   :  { %s1111_s27 = smov [#allocation8]   ;;  %s1052_s5 = scalar_lea.hbm %s1267_s3, 1536 }
  0x36   :  { %s52_s28 = sshll.u32 %s1111_s27, 4  ;;  %p1053_p10 = scmp.ne.s32.totalorder %s1267_s3, %s1052_s5  ;;  %s53_s28 = int_to_ptr.vmem [resolvable:$true] %s52_s28 }
  0x37   :  { %p1056_p11 = scmp.lt.u32.totalorder %s1052_s5, %s1267_s3 }
  0x39   :  { %p1058_p12 = pnand %p1056_p11, %p1053_p10 }
  0x3b   :  { %1061 = shalt.err (!%p1058_p12)
}
  0x3c   :  { %s1062_s11 = scalar_lea.vmem %s53_s28, 1536  ;;  %p1067_p0 = scmp.lt.s32.totalorder %s53_s28, %s53_s28 }
  0x3d   :  { %p1063_p13 = scmp.ne.s32.totalorder %s53_s28, %s1062_s11  ;;  %p1068_p1 = scmp.lt.s32.totalorder %s1062_s11, %s1062_s11 }
  0x3f   :  { %p1069_p2 = por %p1068_p1, %p1067_p0 }
  0x41   :  { %p1070_p3 = pnand %p1069_p2, %p1063_p13 }
  0x43   :  { %1073 = shalt.err (!%p1070_p3)
}
  0x44   :  { %s1112_s2 = smov 256   ;;  %s1113_s6 = smov 16  }
  0x45   :  { %58 = dma.hbm_to_vmem [thread:$0]  %s1267_s3, 1536, %s53_s28, [#allocation9], %s1112_s2, %s1112_s2, %s1113_s6  }
  0x46   :  { %1096 = dma.done.wait [#allocation3], 64  }
  0x47   :  { %1097 = vsyncadd [#allocation3], 4294967232 }
  0x48   :  { %1098 = dma.done.wait [#allocation6], 4096  }
  0x49   :  { %1099 = vsyncadd [#allocation6], 4294963200 }
  0x4a   :  { %1100 = dma.done.wait [#allocation9], 1536  }
  0x4b   :  { %1101 = vsyncadd [#allocation9], 4294965760  ;;  %v1114_v0 = vmov 0   ;;  %v932_v1 = vld [vmem:[#allocation5 + $0x4] ss:$8 sps:$4 sm:$0xff]   ;;  %v956_v18 = vld [vmem:[#allocation7 + $0x10] sm:$0xff]   ;;  %v102_v21 = vlaneseq }
  0x4c   :  { %224 = vmatprep.mubr.bf16.mxu0 %v1114_v0  ;;  %v934_v2 = vld [vmem:[#allocation5] ss:$8 sps:$4 sm:$0xff]   ;;  %192 = vmatprep.subr.bf16.mxu0 %v932_v1  ;;  %v935_v3 = vld [vmem:[#allocation5 + $0x14] ss:$8 sps:$4 sm:$0xff]   ;;  %v937_v4 = vld [vmem:[#allocation5 + $0x10] ss:$8 sps:$4 sm:$0xff]  }
  0x4d   :  { %193 = vmatpush1.bf16.msra.mxu0 %v934_v2  ;;  %v938_v5 = vld [vmem:[#allocation5 + $0x24] ss:$8 sps:$4 sm:$0xff]   ;;  %v940_v6 = vld [vmem:[#allocation5 + $0x20] ss:$8 sps:$4 sm:$0xff]   ;;  %v941_v7 = vld [vmem:[#allocation5 + $0x34] ss:$8 sps:$4 sm:$0xff]  }
  0x4e   :  { %194 = vmatprep.subr.bf16.mxu0 %v935_v3  ;;  %v943_v8 = vld [vmem:[#allocation5 + $0x30] ss:$8 sps:$4 sm:$0xff]   ;;  %v944_v9 = vld [vmem:[#allocation5 + $0x44] ss:$8 sps:$4 sm:$0xff]   ;;  %v946_v10 = vld [vmem:[#allocation5 + $0x40] ss:$8 sps:$4 sm:$0xff]  }
  0x4f   :  { %v947_v11 = vld [vmem:[#allocation5 + $0x54] ss:$8 sps:$4 sm:$0xff]   ;;  %v949_v12 = vld [vmem:[#allocation5 + $0x50] ss:$8 sps:$4 sm:$0xff]   ;;  %v950_v13 = vld [vmem:[#allocation5 + $0x64] ss:$8 sps:$4 sm:$0xff]  }
  0x50   :  { %v952_v14 = vld [vmem:[#allocation5 + $0x60] ss:$8 sps:$4 sm:$0xff]   ;;  %v953_v15 = vld [vmem:[#allocation5 + $0x74] ss:$8 sps:$4 sm:$0xff]   ;;  %v955_v16 = vld [vmem:[#allocation5 + $0x70] ss:$8 sps:$4 sm:$0xff]  }
  0x51   :  { %195 = vmatpush1.bf16.msra.mxu0 %v937_v4  ;;  %v84_v17 = vld [vmem:[#allocation2] sm:$0xf]  ;;  %v1115_v19 = vmov 0.0   ;;  %vm1116_vm0 = vmmov 0   ;;  %v1203_v22 = vshrl.u32 %v102_v21, 7  ;;  %s1117_s3 = smov 32  }
  0x52   :  { %196 = vmatprep.subr.bf16.mxu0 %v938_v5  ;;  %852 = vmatprep.subr.bf16.mxu1 %v1115_v19  ;;  %v957_v20 = vld [vmem:[#allocation7 + $0x18] sm:$0xff]   ;;  %v81_v24 = vld [vmem:[#allocation8 + $0x40] ss:$8 sm:$0x3]  ;;  %s1118_s1 = smov 96   ;;  %vm256_vm1 = vcmask 261120  }
  0x53   :  { %853 = vmatpush3.bf16.msra.mxu1 %v956_v18  ;;  %856 = vmatprep.mubr.msk.bf16.mxu1 %vm1116_vm0, %v1115_v19  ;;  %v104_v23 = vsub.s32 0, %v1203_v22  ;;  %v108_v26 = vsub.s32 1, %v1203_v22  ;;  %v958_v36 = vld [vmem:[#allocation7 + $0x20] sm:$0xff]   ;;  %v959_v37 = vld [vmem:[#allocation7 + $0x28] sm:$0xff]   ;;  %v960_v46 = vld [vmem:[#allocation7 + $0x30] sm:$0xff]   ;;  %s1119_s14 = smov [#allocation10]  }
  0x54   :  { %854 = vmatprep.subr.bf16.mxu1 %v1115_v19  ;;  %v961_v47 = vld [vmem:[#allocation7 + $0x38] sm:$0xff]   ;;  %v962_v56 = vld [vmem:[#allocation7 + $0x40] sm:$0xff]   ;;  %v963_v57 = vld [vmem:[#allocation7 + $0x48] sm:$0xff]   ;;  %s782_s15 = sshll.u32 %s1119_s14, 4  ;;  %s783_s15 = int_to_ptr.vmem [resolvable:$true] %s782_s15 }
  0x55   :  { %197 = vmatpush1.bf16.msra.mxu0 %v940_v6  ;;  %v105_v25 = vrot.slane %v81_v24, %v104_v23  ;;  %v109_v29 = vrot.slane %v81_v24, %v108_v26  ;;  %v964_v2 = vld [vmem:[#allocation7 + $0x50] sm:$0xff]   ;;  %v965_v3 = vld [vmem:[#allocation7 + $0x58] sm:$0xff]   ;;  %s1074_s16 = scalar_lea.vmem %s783_s15, 256  ;;  %p1079_p5 = scmp.lt.s32.totalorder %s783_s15, %s783_s15 }
  0x56   :  { %198 = vmatprep.subr.bf16.mxu0 %v941_v7  ;;  %v968_v24 = vld [vmem:[#allocation7 + $0x70] sm:$0xff]   ;;  %p1075_p4 = scmp.ne.s32.totalorder %s783_s15, %s1074_s16  ;;  %p1080_p6 = scmp.lt.s32.totalorder %s1074_s16, %s1074_s16 }
  0x57   :  { %855 = vmatpush3.bf16.msra.mxu1 %v957_v20 }
  0x58   :  { %860 = vmatprep.subr.bf16.mxu1 %v1115_v19  ;;  %p1081_p7 = por %p1080_p6, %p1079_p5 }
  0x59   :  { %199 = vmatpush1.bf16.msra.mxu0 %v943_v8 }
  0x5a   :  { %200 = vmatprep.subr.bf16.mxu0 %v944_v9  ;;  %p1082_p8 = pnand %p1081_p7, %p1075_p4 }
  0x5d   :  { %201 = vmatpush1.bf16.msra.mxu0 %v946_v10 }
  0x5e   :  { %202 = vmatprep.subr.bf16.mxu0 %v947_v11  ;;  %v966_v11 = vld [vmem:[#allocation7 + $0x60] sm:$0xff]  }
  0x61   :  { %203 = vmatpush1.bf16.msra.mxu0 %v949_v12  ;;  %v967_v12 = vld [vmem:[#allocation7 + $0x68] sm:$0xff]  }
  0x62   :  { %204 = vmatprep.subr.bf16.mxu0 %v950_v13 }
  0x65   :  { %205 = vmatpush1.bf16.msra.mxu0 %v952_v14 }
  0x66   :  { %206 = vmatprep.subr.bf16.mxu0 %v953_v15 }
  0x69   :  { %207 = vmatpush1.bf16.msra.mxu0 %v955_v16 }
  0x6a   :  { %884 = vmatprep.subr.bf16.mxu0 %v1115_v19 }
  0x6c   :  { %225 = vmatmul.mubr.bf16.vlgmr.msra.gmra.mrb[0].mxu0 %v84_v17 }
  0x6d   :  { %888 = vmatprep.mubr.msk.bf16.mxu0 %vm1116_vm0, %v1115_v19  ;;  %885 = vmatpush3.bf16.msra.mxu0 %v964_v2 }
  0x6e   :  { %886 = vmatprep.subr.bf16.mxu0 %v1115_v19 }
  0x71   :  { %887 = vmatpush3.bf16.msra.mxu0 %v965_v3 }
  0x72   :  { %900 = vmatprep.subr.bf16.mxu0 %v1115_v19 }
 0x13f   :  { %v226_v27 = vpop.f32.mrb[0].mxu0 }
 0x140   :  { %v227_v28 = vadd.f32 %v226_v27, %v105_v25  ;;  %v228_v30 = vpop.f32.mrb[1].mxu0  ;;  %v969_v25 = vld [vmem:[#allocation7 + $0x78] sm:$0xff]  }
 0x141   :  { %v230_v31 = vpop.f32.mrb[2].mxu0  ;;  %v1211_v33 = vadd.f32 %v228_v30, %v109_v29 }
 0x142   :  { %970 = vtanh.f32 %v227_v28  ;;  %v231_v32 = vpop.f32.mrb[3].mxu0  ;;  %384 = vrot.lane.b32.xlu1 %v227_v28, %s1117_s3  ;;  %253 = vrot.lane.b32.xlu0 %v227_v28, %s1118_s1 }
 0x146   :  { %512 = vrot.lane.b32.xlu1 %v1211_v33, %s1118_s1  ;;  %319 = vrot.lane.b32.xlu0 %v227_v28, %s1109_s0 }
 0x14a   :  { %642 = vrot.lane.b32.xlu1 %v1211_v33, %s1117_s3  ;;  %577 = vrot.lane.b32.xlu0 %v1211_v33, %s1109_s0 }
 0x14c   :  { %v971_v34 = vpop.eup %970 }
 0x14d   :  { %v234_v35 = vpack.c.bf16 %v971_v34, %v971_v34 }
 0x14f   :  { %857 = vmatmul.mubr.msk.bf16.vlgmr.msra.gmra.mrb[0].mxu1 %vm256_vm1, %v234_v35  ;;  %v73_v35 = vld [vmem:[#allocation8 + $0x8] sm:$0xff] }
 0x150   :  { %864 = vmatprep.mubr.msk.bf16.mxu1 %vm1116_vm0, %v1115_v19  ;;  %861 = vmatpush3.bf16.msra.mxu1 %v958_v36  ;;  %v75_v36 = vld [vmem:[#allocation8 + $0x18] sm:$0xff] }
 0x151   :  { %862 = vmatprep.subr.bf16.mxu1 %v1115_v19 }
 0x154   :  { %863 = vmatpush3.bf16.msra.mxu1 %v959_v37  ;;  %v72_v37 = vld [vmem:[#allocation8] sm:$0xff] }
 0x155   :  { %868 = vmatprep.subr.bf16.mxu1 %v1115_v19 }
 0x1b4   :  { %v254_v38 = vpop.permute.xlu0 %253  ;;  %v385_v58 = vpop.permute.xlu1 %384 }
 0x1b8   :  { %v320_v48 = vpop.permute.xlu0 %319  ;;  %v513_v13 = vpop.permute.xlu1 %512 }
 0x1bc   :  { %v578_v27 = vpop.permute.xlu0 %577 }
 0x222   :  { %v294_v39 = vpop.f32.mrb[0].mxu1 }
 0x223   :  { %v295_v40 = vadd.f32 %v294_v39, %v254_v38  ;;  %v858_v41 = vpop.f32.mrb[1].mxu1  ;;  %v908_v38 = vpack.c.bf16 %v75_v36, %v73_v35  ;;  %v74_v39 = vld [vmem:[#allocation8 + $0x10] sm:$0xff] }
 0x224   :  { %v297_v42 = vpop.f32.mrb[2].mxu1  ;;  %v910_v41 = vpack.c.bf16 %v74_v39, %v72_v37 }
 0x225   :  { %972 = vtanh.f32 %v295_v40  ;;  %v859_v43 = vpop.f32.mrb[3].mxu1  ;;  %v77_v40 = vld [vmem:[#allocation8 + $0x28] sm:$0xff] }
 0x226   :  { %v76_v43 = vld [vmem:[#allocation8 + $0x20] sm:$0xff] }
 0x22f   :  { %v973_v44 = vpop.eup %972 }
 0x230   :  { %v301_v45 = vpack.c.bf16 %v973_v44, %v973_v44  ;;  %v78_v44 = vld [vmem:[#allocation8 + $0x30] sm:$0xff] }
 0x232   :  { %865 = vmatmul.mubr.msk.bf16.vlgmr.msra.gmra.mrb[4].mxu1 %vm256_vm1, %v301_v45  ;;  %v914_v45 = vpack.c.bf16 %v78_v44, %v76_v43 }
 0x233   :  { %872 = vmatprep.mubr.msk.bf16.mxu1 %vm1116_vm0, %v1115_v19  ;;  %869 = vmatpush3.bf16.msra.mxu1 %v960_v46  ;;  %v643_v46 = vpop.permute.xlu1 %642 }
 0x234   :  { %870 = vmatprep.subr.bf16.mxu1 %v1115_v19 }
 0x237   :  { %871 = vmatpush3.bf16.msra.mxu1 %v961_v47 }
 0x238   :  { %876 = vmatprep.subr.bf16.mxu1 %v1115_v19 }
 0x305   :  { %v359_v49 = vpop.f32.mrb[4].mxu1 }
 0x306   :  { %v360_v50 = vadd.f32 %v359_v49, %v320_v48  ;;  %v866_v51 = vpop.f32.mrb[5].mxu1 }
 0x307   :  { %v362_v52 = vpop.f32.mrb[6].mxu1 }
 0x308   :  { %974 = vtanh.f32 %v360_v50  ;;  %v867_v53 = vpop.f32.mrb[7].mxu1 }
 0x309   :  { %v83_v53 = vld [vmem:[#allocation8 + $0x50] ss:$8 sm:$0x3] }
 0x312   :  { %v975_v54 = vpop.eup %974 }
 0x313   :  { %v366_v55 = vpack.c.bf16 %v975_v54, %v975_v54  ;;  %v693_v54 = vrot.slane %v83_v53, %v104_v23 }
 0x315   :  { %873 = vmatmul.mubr.msk.bf16.vlgmr.msra.gmra.mrb[8].mxu1 %vm256_vm1, %v366_v55  ;;  %v697_v55 = vrot.slane %v83_v53, %v108_v26 }
 0x316   :  { %880 = vmatprep.mubr.msk.bf16.mxu1 %vm1116_vm0, %v1115_v19  ;;  %877 = vmatpush3.bf16.msra.mxu1 %v962_v56 }
 0x317   :  { %878 = vmatprep.subr.bf16.mxu1 %v1115_v19 }
 0x31a   :  { %879 = vmatpush3.bf16.msra.mxu1 %v963_v57 }
 0x31b   :  { %892 = vmatprep.subr.bf16.mxu1 %v1115_v19 }
 0x3e8   :  { %v424_v59 = vpop.f32.mrb[8].mxu1 }
 0x3e9   :  { %v425_v60 = vadd.f32 %v424_v59, %v385_v58  ;;  %v874_v61 = vpop.f32.mrb[9].mxu1 }
 0x3ea   :  { %v427_v62 = vpop.f32.mrb[10].mxu1 }
 0x3eb   :  { %976 = vtanh.f32 %v425_v60  ;;  %v875_v63 = vpop.f32.mrb[11].mxu1 }
 0x3f5   :  { %v977_v0 = vpop.eup %976 }
 0x3f6   :  { %v431_v1 = vpack.c.bf16 %v977_v0, %v977_v0 }
 0x3f8   :  { %881 = vmatmul.mubr.msk.bf16.vlgmr.msra.gmra.mrb[12].mxu1 %vm256_vm1, %v431_v1 }
 0x3f9   :  { %896 = vmatprep.mubr.msk.bf16.mxu1 %vm1116_vm0, %v1115_v19  ;;  %893 = vmatpush3.bf16.msra.mxu1 %v966_v11 }
 0x3fa   :  { %894 = vmatprep.subr.bf16.mxu1 %v1115_v19 }
 0x3fd   :  { %895 = vmatpush3.bf16.msra.mxu1 %v967_v12 }
 0x3fe   :  { %909 = vmatprep.subr.bf16.mxu1 %v908_v38 }
 0x4cb   :  { %v486_v4 = vpop.f32.mrb[12].mxu1 }
 0x4cc   :  { %v487_v5 = vadd.f32 %v486_v4, %v1211_v33  ;;  %v882_v6 = vpop.f32.mrb[13].mxu1 }
 0x4cd   :  { %v489_v7 = vpop.f32.mrb[14].mxu1 }
 0x4ce   :  { %978 = vtanh.f32 %v487_v5  ;;  %v883_v8 = vpop.f32.mrb[15].mxu1 }
 0x4d8   :  { %v979_v9 = vpop.eup %978 }
 0x4d9   :  { %v493_v10 = vpack.c.bf16 %v979_v9, %v979_v9 }
 0x4db   :  { %889 = vmatmul.mubr.msk.bf16.vlgmr.msra.gmra.mrb[4].mxu0 %vm256_vm1, %v493_v10 }
 0x4dc   :  { %904 = vmatprep.mubr.msk.bf16.mxu0 %vm1116_vm0, %v1115_v19  ;;  %901 = vmatpush3.bf16.msra.mxu0 %v968_v24 }
 0x4dd   :  { %902 = vmatprep.subr.bf16.mxu0 %v1115_v19 }
 0x4e0   :  { %903 = vmatpush3.bf16.msra.mxu0 %v969_v25 }
 0x5ae   :  { %v552_v14 = vpop.f32.mrb[4].mxu0 }
 0x5af   :  { %v553_v15 = vadd.f32 %v552_v14, %v513_v13  ;;  %v890_v16 = vpop.f32.mrb[5].mxu0 }
 0x5b0   :  { %v555_v17 = vpop.f32.mrb[6].mxu0 }
 0x5b1   :  { %980 = vtanh.f32 %v553_v15  ;;  %v891_v18 = vpop.f32.mrb[7].mxu0 }
 0x5bb   :  { %v981_v20 = vpop.eup %980 }
 0x5bc   :  { %v559_v21 = vpack.c.bf16 %v981_v20, %v981_v20 }
 0x5be   :  { %897 = vmatmul.mubr.msk.bf16.vlgmr.msra.gmra.mrb[16].mxu1 %vm256_vm1, %v559_v21 }
 0x5bf   :  { %767 = vmatprep.mubr.f32.mxu1 %v1115_v19  ;;  %v79_v19 = vld [vmem:[#allocation8 + $0x38] sm:$0xff]  ;;  %911 = vmatpush1.bf16.msra.mxu1 %v910_v41 }
 0x5c0   :  { %v912_v42 = vpack.c.bf16 %v79_v19, %v77_v40 }
 0x5c2   :  { %913 = vmatprep.subr.bf16.mxu1 %v912_v42 }
 0x5c3   :  { %915 = vmatpush1.bf16.msra.mxu1 %v914_v45 }
 0x691   :  { %v617_v28 = vpop.f32.mrb[16].mxu1 }
 0x692   :  { %v618_v29 = vadd.f32 %v617_v28, %v578_v27  ;;  %v898_v30 = vpop.f32.mrb[17].mxu1 }
 0x693   :  { %v620_v31 = vpop.f32.mrb[18].mxu1 }
 0x694   :  { %982 = vtanh.f32 %v618_v29  ;;  %v899_v32 = vpop.f32.mrb[19].mxu1 }
 0x69e   :  { %v983_v33 = vpop.eup %982 }
 0x69f   :  { %v624_v34 = vpack.c.bf16 %v983_v33, %v983_v33 }
 0x6a1   :  { %905 = vmatmul.mubr.msk.bf16.vlgmr.msra.gmra.mrb[8].mxu0 %vm256_vm1, %v624_v34 }
 0x774   :  { %v682_v47 = vpop.f32.mrb[8].mxu0 }
 0x775   :  { %v683_v48 = vadd.f32 %v682_v47, %v643_v46  ;;  %v906_v49 = vpop.f32.mrb[9].mxu0 }
 0x776   :  { %v685_v50 = vpop.f32.mrb[10].mxu0 }
 0x777   :  { %984 = vtanh.f32 %v683_v48  ;;  %v907_v51 = vpop.f32.mrb[11].mxu0 }
 0x781   :  { %v985_v52 = vpop.eup %984 }
 0x782   :  { %830 = vmatmul.mubr.msk.f32.vlgmr.msra.gmra.mrb[20].mxu1 %vm256_vm1, %v985_v52 }
 0x855   :  { %v769_v56 = vpop.f32.mrb[20].mxu1 }
 0x856   :  { %v770_v57 = vadd.f32 %v769_v56, %v693_v54  ;;  %v771_v58 = vpop.f32.mrb[21].mxu1 }
 0x857   :  { %v772_v59 = vadd.f32 %v771_v58, %v697_v55 }
 0x858   :  { %774 = vst [vmem:[#allocation10] sm:$0xff] %v770_v57 }
 0x859   :  { %775 = vst [vmem:[#allocation10 + $0x8] sm:$0xff] %v772_v59 }
 0x85a   :  { %1085 = shalt.err (!%p1082_p8)
}
 0x85b   :  { %s1086_s19 = scalar_lea.hbm %s1268_s4, 256 }
 0x85c   :  { %p1087_p9 = scmp.ne.s32.totalorder %s1268_s4, %s1086_s19  ;;  %p1090_p10 = scmp.lt.u32.totalorder %s1086_s19, %s1268_s4 }
 0x85e   :  { %p1092_p11 = pnand %p1090_p10, %p1087_p9 }
 0x860   :  { %1095 = shalt.err (!%p1092_p11)
}
 0x861   :  { %785 = dma.vmem_to_hbm [thread:$0]  %s783_s15, 256, %s1268_s4, [#allocation4]  }
 0x862   :  { %1102 = dma.done.wait [#allocation4], 256  }
 0x863   :  { %1103 = vsyncadd [#allocation4], 4294967040 }
 0x864   :  { %789 = vsyncpa [#allocation3], 1 }
 0x865   :  { %790 = vsyncpa [#allocation6], 1 }
 0x866   :  { %791 = vsyncpa [#allocation9], 1 }
 0x867   :  { %792 = vsyncpa [#allocation4], 1 }

</bundles_post_ra>
